<compile_context>
chip_gen: v6e
topology: v6e:2x2x1
jax: 0.10.0
libtpu: 0.0.40
codegen_flags: <defaults>
</compile_context>

<pallas_src>
import math

import jax
import jax.numpy as jnp
from jax.experimental import pallas as pl
from jax.experimental.pallas import tpu as pltpu

_SQRT_2_OVER_PI = math.sqrt(2.0 / math.pi)


def _gelu_kernel(x_ref, o_ref):
    x = x_ref[...].astype(jnp.float32)
    c0 = jnp.float32(_SQRT_2_OVER_PI)
    c1 = jnp.float32(_SQRT_2_OVER_PI * 0.044715)
    inner = x * (c0 + c1 * x * x)                                     # folded constants
    y = jnp.float32(0.5) * x * (jnp.float32(1.0) + jnp.tanh(inner))   # tanh -> EUP
    o_ref[...] = y.astype(o_ref.dtype)


def _cdiv(a, b):
    return -(-a // b)


def _round_up(a, m):
    return _cdiv(a, m) * m


def _sublane_multiple(itemsize):
    # Sub-32-bit dtypes pack along sublanes: round row tiles accordingly.
    return {4: 8, 2: 16, 1: 32}.get(itemsize, 8)


def _tpu_info():
    """Returns (two_tensorcores_per_chip, physical_vmem_bytes) with safe fallbacks."""
    vmem_cap = None
    try:
        vmem_cap = int(pltpu.get_tpu_info().vmem_capacity_bytes)
    except Exception:
        pass
    kind = ""
    try:
        kind = str(jax.devices()[0].device_kind).lower()
    except Exception:
        pass
    two_cores = ("v7" in kind) or ("tpu7" in kind) or ("7x" in kind)
    if vmem_cap is None:
        vmem_cap = (64 << 20) if two_cores else (128 << 20)
    return two_cores, vmem_cap


def _choose_cols(n, max_cols=2048):
    """Largest multiple of 128 (<= max_cols) dividing n, or None if n % 128 != 0."""
    if n % 128 != 0:
        return None
    for cand in range(max_cols, 127, -128):
        if n % cand == 0:
            return cand
    return 128


def _choose_tile_rows(rows, cols, itemsize, two_cores, target_bytes=8 << 20):
    """Row block: ~target_bytes per block, dtype-aware sublane rounding.
    On 2-TC chips, nudge toward an even number (>=2) of grid steps."""
    s = _sublane_multiple(itemsize)
    tr = max(s, (target_bytes // max(1, cols * itemsize)) // s * s)
    tr = min(tr, _round_up(rows, s))
    if two_cores and rows > s:
        steps = _cdiv(rows, tr)
        if steps < 2:
            tr = max(s, _round_up(_cdiv(rows, 2), s))
            steps = _cdiv(rows, tr)
        if steps > 1 and steps % 2 == 1:
            cand = max(s, _round_up(_cdiv(rows, steps + 1), s))
            if _cdiv(rows, cand) % 2 == 0:
                tr = cand
    if tr >= rows:
        tr = rows
    return tr


def gelu_pallas(x):
    """Tanh-approx GELU (matches the torch GELU module), as a Pallas TPU kernel."""
    orig_shape = x.shape
    orig_dtype = x.dtype
    n = x.size
    if n == 0:
        return x
    itemsize = jnp.dtype(orig_dtype).itemsize
    two_cores, vmem_cap = _tpu_info()
    vmem_budget_cap = (vmem_cap * 3) // 4  # 48 MiB on v7x, 96 MiB on v5e/v6e

    cols = _choose_cols(n)
    if cols is not None:
        # Lane-aligned fast path: free refold, no padded copies.
        rows = n // cols
        x2 = x.reshape(rows, cols)
        tr = _choose_tile_rows(rows, cols, itemsize, two_cores)
        block_shape = (tr, cols)
        grid = (_cdiv(rows, tr),)
        index_map = lambda i: (i, 0)
        block_bytes = _round_up(tr, _sublane_multiple(itemsize)) * cols * itemsize
    else:
        # Ragged path: (1, n) view tiled along the lane axis; last block is
        # masked by Pallas -> 1 HBM read + 1 HBM write, no pad/slice copies.
        x2 = x.reshape(1, n)
        if n <= 128:
            bc = n  # full (ragged) lane dim is allowed as a block dim
        else:
            bc = min(_round_up(n, 128),
                     max(128, ((1 << 20) // itemsize) // 128 * 128))
        block_shape = (1, bc)
        grid = (_cdiv(n, bc),)
        index_map = lambda i: (0, i)
        block_bytes = 8 * bc * itemsize  # VMEM layout pads the row dim to 8 sublanes

    vmem_limit = int(min(vmem_budget_cap, max(32 << 20, 6 * block_bytes)))

    out = pl.pallas_call(
        _gelu_kernel,
        out_shape=jax.ShapeDtypeStruct(x2.shape, orig_dtype),
        grid=grid,
        in_specs=[pl.BlockSpec(block_shape, index_map)],
        out_specs=pl.BlockSpec(block_shape, index_map),
        compiler_params=pltpu.CompilerParams(
            dimension_semantics=("parallel",),
            vmem_limit_bytes=vmem_limit,
        ),
        cost_estimate=pl.CostEstimate(
            flops=10 * n,
            transcendentals=n,
            bytes_accessed=2 * n * itemsize,
        ),
    )(x2)

    return out.reshape(orig_shape)


def gelu_reference(x):
    xf = x.astype(jnp.float32)
    y = 0.5 * xf * (1.0 + jnp.tanh(_SQRT_2_OVER_PI * (xf + 0.044715 * xf ** 3)))
    return y.astype(x.dtype)


if __name__ == "__main__":
    key = jax.random.PRNGKey(0)

    # Typical transformer activation: (batch, seq, hidden) — aligned fast path.
    x = jax.random.normal(key, (2, 8, 32), dtype=jnp.float32)
    y = jax.block_until_ready(gelu_pallas(x))
    y_ref = gelu_reference(x)
    assert y.shape == x.shape and y.dtype == x.dtype
    assert jnp.max(jnp.abs(y - y_ref)) < 1e-5

    # Ragged size (n % 128 != 0) — exercises the masked lane-axis path.
    x2 = jax.random.normal(jax.random.PRNGKey(0), (3, 5, 7), dtype=jnp.float32)
    y2 = jax.block_until_ready(gelu_pallas(x2))
    assert y2.shape == x2.shape and y2.dtype == x2.dtype
    assert jnp.max(jnp.abs(y2 - gelu_reference(x2))) < 1e-5

    print("KERNEL_OK")
</pallas_src>

<mosaic_0001>
module attributes {stable_mosaic.version = 11 : i64} {
  func.func @_gelu_kernel(%arg0: i32, %arg1: memref<1x512xf32, #tpu.memory_space<vmem>>, %arg2: memref<1x512xf32, #tpu.memory_space<vmem>>) attributes {dimension_semantics = [#tpu.dimension_semantics<parallel>], iteration_bounds = array<i64: 1>, scalar_prefetch = 0 : i64, scratch_operands = 0 : i64, tpu.core_type = #tpu.core_type<tc>, window_params = [{transform_indices = @transform_0, window_bounds = array<i64: 1, 512>}, {transform_indices = @transform_1, window_bounds = array<i64: 1, 512>}]} {
    %c0 = arith.constant 0 : index
    %c0_0 = arith.constant 0 : index
    %0 = vector.load %arg1[%c0, %c0_0] : memref<1x512xf32, #tpu.memory_space<vmem>>, vector<1x512xf32>
    %cst = arith.constant 0.0356774069 : f32
    %1 = vector.broadcast %cst : f32 to vector<1x512xf32>
    %2 = arith.mulf %1, %0 : vector<1x512xf32>
    %3 = arith.mulf %2, %0 : vector<1x512xf32>
    %cst_1 = arith.constant 0.797884583 : f32
    %4 = vector.broadcast %cst_1 : f32 to vector<1x512xf32>
    %5 = arith.addf %4, %3 : vector<1x512xf32>
    %6 = arith.mulf %0, %5 : vector<1x512xf32>
    %cst_2 = arith.constant 5.000000e-01 : f32
    %7 = vector.broadcast %cst_2 : f32 to vector<1x512xf32>
    %8 = arith.mulf %7, %0 : vector<1x512xf32>
    %9 = math.tanh %6 : vector<1x512xf32>
    %cst_3 = arith.constant 1.000000e+00 : f32
    %10 = vector.broadcast %cst_3 : f32 to vector<1x512xf32>
    %11 = arith.addf %10, %9 : vector<1x512xf32>
    %12 = arith.mulf %8, %11 : vector<1x512xf32>
    %c0_4 = arith.constant 0 : index
    %c0_5 = arith.constant 0 : index
    %13 = vector.load %arg2[%c0_4, %c0_5] : memref<1x512xf32, #tpu.memory_space<vmem>>, vector<1x512xf32>
    tpu.vector_store %arg2[%c0_4, %c0_5], %12 {strides = array<i32>} : memref<1x512xf32, #tpu.memory_space<vmem>>, vector<1x512xf32>,
    return
  }
  func.func @transform_0(%arg0: i32) -> (i32, i32) {
    %c0_i32 = arith.constant 0 : i32
    %c0_i32_0 = arith.constant 0 : i32
    return %arg0, %c0_i32 : i32, i32
  }
  func.func @transform_1(%arg0: i32) -> (i32, i32) {
    %c0_i32 = arith.constant 0 : i32
    %c0_i32_0 = arith.constant 0 : i32
    return %arg0, %c0_i32 : i32, i32
  }
}

</mosaic_0001>

<bundles_post_ra>
// kernel: tpu_custom_call.1
= control target key start
LH: loop header
LB: loop body
LE: loop exit
PB: predicated region body
PF: predicated region fallthrough
CT: control target
= control target key end

     0   :  { %6 = vsyncpa [#allocation3], 0  ;;  %s116_s0 = inlined_call_operand.hbm [shape: f32[1,512], index: 0, kind: input, shape index: {}]   ;;  %s117_s1 = inlined_call_operand.hbm [shape: f32[1,512], index: 1, kind: output, shape index: {}]  }
   0x1   :  { %7 = vsyncpa [#allocation4], 0  ;;  %s98_s6 = smov [#allocation2]  }
   0x2   :  { %s14_s7 = sshll.u32 %s98_s6, 4  ;;  %s15_s7 = int_to_ptr.vmem [resolvable:$true] %s14_s7 }
   0x3   :  { %s62_s8 = scalar_lea.vmem %s15_s7, 64  ;;  %p67_p1 = scmp.lt.s32.totalorder %s15_s7, %s15_s7 }
   0x4   :  { %p63_p0 = scmp.ne.s32.totalorder %s15_s7, %s62_s8  ;;  %p68_p2 = scmp.lt.s32.totalorder %s62_s8, %s62_s8 }
   0x6   :  { %p69_p3 = por %p68_p2, %p67_p1 }
   0x8   :  { %p70_p4 = pnand %p69_p3, %p63_p0 }
   0xa   :  { %73 = shalt.err (!%p70_p4)
}
   0xb   :  { %17 = dma.hbm_to_vmem [thread:$0]  %s116_s0, 64, %s15_s7, [#allocation3]  }
   0xc   :  { %94 = dma.done.wait [#allocation3], 64  }
   0xd   :  { %95 = vsyncadd [#allocation3], 4294967232  ;;  %v21_v0 = vld [vmem:[#allocation2] sm:$0xf]  ;;  %v30_v5 = vlaneseq  ;;  %s99_s11 = smov [#allocation5]  }
   0xe   :  { %v22_v1 = vmul.f32 0.035677407, %v21_v0  ;;  %v26_v6 = vmul.f32 0.5, %v21_v0  ;;  %s41_s12 = sshll.u32 %s99_s11, 4  ;;  %s42_s12 = int_to_ptr.vmem [resolvable:$true] %s41_s12 }
   0xf   :  { %vm32_vm0 = vcmp.lt.s32.totalorder %v30_v5, 512  ;;  %s74_s13 = scalar_lea.vmem %s42_s12, 64  ;;  %p79_p6 = scmp.lt.s32.totalorder %s42_s12, %s42_s12 }
  0x10   :  { %v23_v2 = vmul.f32 %v22_v1, %v21_v0  ;;  %p75_p5 = scmp.ne.s32.totalorder %s42_s12, %s74_s13  ;;  %p80_p7 = scmp.lt.s32.totalorder %s74_s13, %s74_s13 }
  0x12   :  { %v24_v3 = vadd.f32 0.7978846, %v23_v2  ;;  %p81_p8 = por %p80_p7, %p79_p6 }
  0x14   :  { %v25_v4 = vmul.f32 %v24_v3, %v21_v0  ;;  %p82_p9 = pnand %p81_p8, %p75_p5 }
  0x16   :  { %52 = vtanh.f32 %v25_v4 }
  0x23   :  { %v53_v7 = vpop.eup %52 }
  0x24   :  { %v28_v8 = vadd.f32 1.0, %v53_v7 }
  0x26   :  { %v29_v9 = vmul.f32 %v28_v8, %v26_v6 }
  0x28   :  { %34 = vst.msk [vmem:[#allocation5] sm:$0xf] %vm32_vm0, %v29_v9 }
  0x29   :  { %85 = shalt.err (!%p82_p9)
}
  0x2a   :  { %44 = dma.vmem_to_hbm [thread:$0]  %s42_s12, 64, %s117_s1, [#allocation4]  }
  0x2b   :  { %96 = dma.done.wait [#allocation4], 64  }
  0x2c   :  { %97 = vsyncadd [#allocation4], 4294967232 }
  0x2d   :  { %48 = vsyncpa [#allocation3], 1 }
  0x2e   :  { %49 = vsyncpa [#allocation4], 1 }

</bundles_post_ra>
